<compile_context>
chip_gen: v7x
topology: tpu7x:2x2x1
jax: 0.10.0
libtpu: 0.0.40
codegen_flags: <defaults>
</compile_context>

<pallas_src>
import jax
import jax.numpy as jnp
from jax import lax
from jax.experimental import pallas as pl
from jax.experimental.pallas import tpu as pltpu

EPS = 1e-5


# ---------------------------------------------------------------------------
# Kernels
# ---------------------------------------------------------------------------
def _in_kernel_full(x_ref, o_ref):
    """Mask-free instance norm over the full time axis. Block: (tr, T) rows of (b,c)."""
    x = x_ref[...].astype(jnp.float32)                          # (tr, T), compute in f32
    n = x.shape[-1]
    mean = jnp.sum(x, axis=-1, keepdims=True) / float(n)        # (tr, 1)
    xm = x - mean                                               # reused for var and output
    var = jnp.sum(xm * xm, axis=-1, keepdims=True) / (n - 1.0)  # unbiased (torch default)
    o_ref[...] = (xm * lax.rsqrt(var + EPS)).astype(o_ref.dtype)


def _in_kernel_masked(lens_ref, x_ref, o_ref):
    """Valid-length (per batch) instance norm. Block: (1, tc, T)."""
    b = pl.program_id(0)
    L = lens_ref[b]                                             # SMEM scalar
    x = x_ref[0].astype(jnp.float32)                            # (tc, T)
    T = x.shape[-1]
    valid = lax.broadcasted_iota(jnp.int32, (1, T), 1) < L      # (1, T) bool, bcast over C
    Lf = L.astype(jnp.float32)
    mean = jnp.sum(jnp.where(valid, x, 0.0), axis=-1, keepdims=True) / Lf
    xm = x - mean
    d = jnp.where(valid, xm, 0.0)
    var = jnp.sum(d * d, axis=-1, keepdims=True) / (Lf - 1.0)   # unbiased
    o_ref[0] = (xm * lax.rsqrt(var + EPS)).astype(o_ref.dtype)


# ---------------------------------------------------------------------------
# Wrapper
# ---------------------------------------------------------------------------
def _vmem_plan():
    """(per-step footprint budget, vmem_limit_bytes) sized per TPU generation."""
    try:
        cap = pltpu.get_tpu_info().vmem_capacity_bytes
    except Exception:
        cap = 64 << 20                       # unknown -> assume smallest (v7x-class)
    if cap <= (64 << 20):                    # v7x: 64 MiB physical (32 MiB default scoped)
        return 36 << 20, 48 << 20
    return 80 << 20, 100 << 20               # v5e / v6e: 128 MiB physical


def _row_tile(n_rows, want):
    """Largest legal sublane tile <= want (multiple of 8, or the full dim)."""
    if want >= n_rows or n_rows <= 8:
        return n_rows
    return max(8, (want // 8) * 8)


def instance_norm_1d(x, x_lens=None):
    """x: [B, C, T] (f32 or bf16), x_lens: optional int32[B] -> same shape/dtype as x.

    x_lens=None reproduces the PyTorch InstanceNorm1D.forward exactly (stats over full T).
    """
    B, C, T = x.shape
    io_bytes = jnp.dtype(x.dtype).itemsize
    footprint_budget, vmem_limit = _vmem_plan()
    # 2 in + 2 out pipeline buffers (I/O dtype) + ~3 full-tile f32 temps, per row of tile.
    per_row = (4 * io_bytes + 3 * 4) * T
    # TODO(synk): if even 8 rows x T overflows the budget (extremely long T), a two-pass
    #             T-tiled reduction would be needed; not required at GradTTS shapes.

    if x_lens is None:
        # Fast path: flatten (B, C) -> rows so the grid has many equal parallel steps.
        BC = B * C
        x2 = x.reshape(BC, T)
        want = max(8, footprint_budget // per_row)
        if BC >= 16:
            want = min(want, max(8, (BC // 2 // 8) * 8))  # >= 2 steps for 2-TC chips (v7x)
        tr = _row_tile(BC, want)
        out = pl.pallas_call(
            _in_kernel_full,
            out_shape=jax.ShapeDtypeStruct((BC, T), x.dtype),
            grid_spec=pl.GridSpec(
                grid=(pl.cdiv(BC, tr),),
                in_specs=[pl.BlockSpec((tr, T), lambda i: (i, 0))],
                out_specs=pl.BlockSpec((tr, T), lambda i: (i, 0)),
            ),
            compiler_params=pltpu.CompilerParams(
                dimension_semantics=("parallel",),
                vmem_limit_bytes=vmem_limit,
            ),
        )(x2)
        return out.reshape(B, C, T)

    # Masked path: per-batch valid length, tile over channels.
    x_lens = x_lens.astype(jnp.int32)
    want = max(8, footprint_budget // per_row)
    tc = _row_tile(C, want)
    return pl.pallas_call(
        _in_kernel_masked,
        out_shape=jax.ShapeDtypeStruct((B, C, T), x.dtype),
        grid_spec=pltpu.PrefetchScalarGridSpec(
            num_scalar_prefetch=1,
            grid=(B, pl.cdiv(C, tc)),
            in_specs=[pl.BlockSpec((1, tc, T), lambda b, c, lens: (b, c, 0))],
            out_specs=pl.BlockSpec((1, tc, T), lambda b, c, lens: (b, c, 0)),
        ),
        compiler_params=pltpu.CompilerParams(
            dimension_semantics=("parallel", "parallel"),
            vmem_limit_bytes=vmem_limit,
        ),
    )(x_lens, x)


# ---------------------------------------------------------------------------
# Pure-JAX references
# ---------------------------------------------------------------------------
def _reference_spec(x):
    # Exact semantics of the PyTorch InstanceNorm1D.forward (x_lengths ignored).
    mean = x.mean(axis=-1, keepdims=True)
    var = x.var(axis=-1, ddof=1, keepdims=True)
    std = jnp.sqrt(var + EPS)
    return (x - mean) / std


def _reference_masked(x, x_lens):
    outs = []
    for b in range(x.shape[0]):
        L = int(x_lens[b])
        xb = x[b]
        valid = xb[:, :L]
        mean = valid.mean(axis=-1, keepdims=True)
        var = valid.var(axis=-1, ddof=1, keepdims=True)
        std = jnp.sqrt(var + EPS)
        outs.append((xb - mean) / std)
    return jnp.stack(outs)


if __name__ == "__main__":
    key = jax.random.PRNGKey(0)
    B, C, T = 2, 8, 16
    x = jax.random.normal(key, (B, C, T), dtype=jnp.float32)

    # 1) Base-module semantics: stats over the full time axis (mask-free fast path).
    out = instance_norm_1d(x)
    out = jax.block_until_ready(out)
    ref = _reference_spec(x)
    assert out.shape == (B, C, T)
    assert jnp.allclose(out, ref, atol=1e-4, rtol=1e-4), (
        f"full-length max err {jnp.max(jnp.abs(out - ref))}"
    )

    # 2) Optional masked path (valid-length stats), also supported by the kernel.
    x_lens = jnp.array([12, 16], dtype=jnp.int32)
    out_m = instance_norm_1d(x, x_lens)
    out_m = jax.block_until_ready(out_m)
    ref_m = _reference_masked(x, x_lens)
    assert jnp.allclose(out_m, ref_m, atol=1e-4, rtol=1e-4), (
        f"masked max err {jnp.max(jnp.abs(out_m - ref_m))}"
    )

    print("KERNEL_OK")
</pallas_src>

<mosaic_0001>
module attributes {stable_mosaic.version = 11 : i64} {
  func.func @_in_kernel_full(%arg0: i32, %arg1: memref<8x16xf32, #tpu.memory_space<vmem>>, %arg2: memref<8x16xf32, #tpu.memory_space<vmem>>) attributes {dimension_semantics = [#tpu.dimension_semantics<parallel>], iteration_bounds = array<i64: 2>, scalar_prefetch = 0 : i64, scratch_operands = 0 : i64, tpu.core_type = #tpu.core_type<tc>, window_params = [{transform_indices = @transform_0, window_bounds = array<i64: 8, 16>}, {transform_indices = @transform_1, window_bounds = array<i64: 8, 16>}]} {
    %c0 = arith.constant 0 : index
    %c0_0 = arith.constant 0 : index
    %0 = vector.load %arg1[%c0, %c0_0] : memref<8x16xf32, #tpu.memory_space<vmem>>, vector<8x16xf32>
    %cst = arith.constant dense<0.000000e+00> : vector<8xf32>
    %1 = vector.multi_reduction <add>, %0, %cst [1] : vector<8x16xf32> to vector<8xf32>
    %2 = vector.shape_cast %1 : vector<8xf32> to vector<8x1xf32>
    %cst_1 = arith.constant 1.600000e+01 : f32
    %3 = vector.broadcast %cst_1 : f32 to vector<8x1xf32>
    %4 = arith.divf %2, %3 : vector<8x1xf32>
    %5 = vector.broadcast %4 : vector<8x1xf32> to vector<8x16xf32>
    %6 = arith.subf %0, %5 : vector<8x16xf32>
    %7 = arith.mulf %6, %6 : vector<8x16xf32>
    %cst_2 = arith.constant dense<0.000000e+00> : vector<8xf32>
    %8 = vector.multi_reduction <add>, %7, %cst_2 [1] : vector<8x16xf32> to vector<8xf32>
    %9 = vector.shape_cast %8 : vector<8xf32> to vector<8x1xf32>
    %cst_3 = arith.constant 1.500000e+01 : f32
    %10 = vector.broadcast %cst_3 : f32 to vector<8x1xf32>
    %11 = arith.divf %9, %10 : vector<8x1xf32>
    %cst_4 = arith.constant 9.99999974E-6 : f32
    %12 = vector.broadcast %cst_4 : f32 to vector<8x1xf32>
    %13 = arith.addf %11, %12 : vector<8x1xf32>
    %14 = math.rsqrt %13 : vector<8x1xf32>
    %15 = vector.broadcast %14 : vector<8x1xf32> to vector<8x16xf32>
    %16 = arith.mulf %6, %15 : vector<8x16xf32>
    %c0_5 = arith.constant 0 : index
    %c0_6 = arith.constant 0 : index
    %17 = vector.load %arg2[%c0_5, %c0_6] : memref<8x16xf32, #tpu.memory_space<vmem>>, vector<8x16xf32>
    tpu.vector_store %arg2[%c0_5, %c0_6], %16 {strides = array<i32>} : memref<8x16xf32, #tpu.memory_space<vmem>>, vector<8x16xf32>,
    return
  }
  func.func @transform_0(%arg0: i32) -> (i32, i32) {
    %c0_i32 = arith.constant 0 : i32
    %c0_i32_0 = arith.constant 0 : i32
    return %arg0, %c0_i32 : i32, i32
  }
  func.func @transform_1(%arg0: i32) -> (i32, i32) {
    %c0_i32 = arith.constant 0 : i32
    %c0_i32_0 = arith.constant 0 : i32
    return %arg0, %c0_i32 : i32, i32
  }
}

</mosaic_0001>

<bundles_post_ra>
// kernel: tpu_custom_call.1
= control target key start
LH: loop header
LB: loop body
LE: loop exit
PB: predicated region body
PF: predicated region fallthrough
CT: control target
= control target key end

     0   :  { %6 = vsyncpa [#allocation3], 0  ;;  %s568_s0 = inlined_call_operand.hbm [shape: f32[16,16], index: 0, kind: input, shape index: {}]   ;;  %s569_s1 = inlined_call_operand.hbm [shape: f32[16,16], index: 1, kind: output, shape index: {}]  }
   0x1   :  { %8 = vsyncpa [#allocation3 + $0x1], 0 }
   0x2   :  { %9 = vsyncpa [#allocation4], 0 }
   0x3   :  { %11 = vsyncpa [#allocation4 + $0x1], 0  ;;  %s404_s6 = smov 0   ;;  %s406_s7 = smov 0  }
   0x4   :  { %s408_s8 = smov 0   ;;  %s410_s9 = smov 0  }
   0x5 LB: > { %s425_s10 = sadd.s32 4294967295, %s390_s9   ;;  %s234_s11 = sadd.s32 4294967294, %s390_s9   ;;  %s390_s9 = sphi %s410_s9, %s584_s9   ;;  %s386_s8 = sphi %s408_s8, %s583_s8   ;;  %s382_s7 = sphi %s406_s7, %s582_s7   ;;  %s378_s6 = sphi %s404_s6, %s581_s6  }
   0x6   : > { %s429_s12 = sadd.s32 1, %s390_s9   ;;  %s24_s13 = sadd.s32 1, %s386_s8 }
   0x7   : > { %s21_s14 = ssub.s32 %s390_s9, %s429_s12  ;;  %p31_p0 = scmp.ne.s32.totalorder %s386_s8, %s382_s7 }
   0x8   : > { %p22_p1 = scmp.eq.s32.totalorder %s21_s14, 0  ;;  %p32_p2 = scmp.eq.s32.totalorder %s390_s9, 0 }
   0x9   : > { %p37_p3 = scmp.ne.s32.totalorder %s382_s7, %s378_s6  ;;  %p38_p4 = scmp.eq.s32.totalorder %s425_s10, 0 }
   0xa   : > { %s441_s15 = scalar_select %p22_p1, %s386_s8, %s24_s13  }
   0xb   : > { %p443_p5 = por %p32_p2, %p31_p0  ;;  %p447_p6 = por %p38_p4, %p37_p3 }
   0xc   : > { %p61_p7 = scmp.eq.s32.totalorder %s425_s10, 1  ;;  %p67_p8 = scmp.eq.s32.totalorder %s234_s11, 1 }
   0xd   : > { %p258_p10 = scmp.lt.s32.totalorder %s390_s9, 2  ;;  %s87_s20 = sand.u32 1, %s386_s8  }
   0xe   : > { %p454_p11 = por %p61_p7, %p31_p0  ;;  %p458_p12 = por %p67_p8, %p37_p3 }
   0xf   : > { %s238_s21 = sshll.u32 %s390_s9, 7  ;;  %s237_s22 = sshll.u32 %s87_s20, 3 }
  0x10   : > { %s573_s18 = scalar_select %p454_p11, 1, 0 }
  0x11   : > { %s574_s19 = scalar_select %p458_p12, 1, 0 }
  0x12   : > { %s467_s25 = scalar_lea.hbm %s568_s0, %s238_s21  ;;  %s91_s26 = scalar_lea.vmem [#allocation2], %s237_s22 }
  0x13   : > { %s98_s27 = sshll.u32 %s91_s26, 4  ;;  %p471_p13 = pnand %p258_p10, %p443_p5  ;;  %s475_s27 = int_to_ptr.vmem [resolvable:$true] %s98_s27 }
  0x14   : > { %s88_s29 = scalar_lea.sflag [#allocation3], %s87_s20  ;;  %s294_s30 = scalar_lea.hbm %s467_s25, 128 }
  0x15   : > { %p295_p2 = scmp.ne.s32.totalorder %s467_s25, %s294_s30  ;;  %p296_p3 = pneg %p471_p13 }
  0x16   : > { %s299_s4 = scalar_lea.hbm %s568_s0, 256  ;;  %p300_p5 = scmp.lt.u32.totalorder %s467_s25, %s568_s0 }
  0x17   : > { %p297_p4 = pnand %p296_p3, %p295_p2  ;;  %p301_p8 = scmp.lt.u32.totalorder %s299_s4, %s294_s30 }
  0x18   : > { %p303_p9 = scmp.lt.u32.totalorder %s294_s30, %s467_s25 }
  0x19   : > { %p298_p7 = pneg %p297_p4  ;;  %p302_p10 = por %p301_p8, %p300_p5 }
  0x1b   : > { %p304_p0 = por %p303_p9, %p302_p10 }
  0x1d   : > { %p305_p1 = pnand %p304_p0, %p298_p7 }
  0x1f   : > { %308 = shalt.err (!%p305_p1)
}
  0x20   : > { %s309_s13 = scalar_lea.vmem %s475_s27, 128  ;;  %s392_s14 = smov [#allocation2]  }
  0x21   : > { %p310_p2 = scmp.ne.s32.totalorder %s475_s27, %s309_s13  ;;  %s314_s16 = sshll.u32 %s392_s14, 4  ;;  %s315_s16 = int_to_ptr.vmem [resolvable:$false] %s314_s16 }
  0x22   : > { %s316_s20 = scalar_lea.vmem %s315_s16, 256  ;;  %p317_p11 = scmp.lt.s32.totalorder %s475_s27, %s315_s16 }
  0x23   : > { %p312_p4 = pnand %p310_p2, %p296_p3  ;;  %p318_p5 = scmp.lt.s32.totalorder %s316_s20, %s309_s13 }
  0x25   : > { %p313_p12 = pneg %p312_p4  ;;  %p319_p8 = por %p318_p5, %p317_p11 }
  0x27   : > { %p320_p9 = pnand %p319_p8, %p313_p12 }
  0x29   : > { %323 = shalt.err (!%p320_p9)
}
  0x2a   : > { %253 = dma.hbm_to_vmem [thread:$0]  (!%p471_p13), %s467_s25, 128, %s475_s27, %s88_s29  }
  0x2b   : > { %p576_p0 = scmp.lt.s32.totalorder %s390_s9, 3  ;;  %p577_p1 = scmp.ge.s32.totalorder %s390_s9, 1 }
  0x2d   : > { %p104_p3 = pnand %p577_p1, %p576_p0 }
  0x2e   : > { %s509_s21 = sand.u32 (!%p104_p3), 1, %s382_s7  }
  0x2f   : > { %107 = sbr.rel (%p104_p3) target bundleno = 379 (0x17b), region = 24  ;;  %s240_s22 = sshll.u32 (!%p104_p3), %s509_s21, 3 }
  0x30   : > { %s110_s23 = scalar_lea.sflag (!%p104_p3), [#allocation3], %s509_s21  ;;  %s113_s24 = scalar_lea.vmem (!%p104_p3), [#allocation2], %s240_s22 }
  0x36   : > { %369 = dma.done.wait (%p447_p6), %s110_s23, 128  }
  0x37   : > { %371 = vsyncadd (%p447_p6), %s110_s23, 4294967168  ;;  %vm133_vm0 = vcmask 130048   ;;  %v132_v0 = vld [vmem:[%s113_s24] sm:$0xff]  ;;  %s243_s17 = sshll.u32 %s425_s10, 7  ;;  %s131_s25 = scalar_lea.vmem [#allocation5], %s240_s22 }
  0x38   : > { %v134_v1 = vsel %vm133_vm0, %v132_v0, 0.0  ;;  %s164_s26 = sshll.u32 %s131_s25, 4  ;;  %s523_s29 = scalar_lea.hbm %s569_s1, %s243_s17  ;;  %s525_s26 = int_to_ptr.vmem [resolvable:$true] %s164_s26 }
  0x39   : > { %135 = vadd.xlane.f32.xlu0 %v134_v1  ;;  %s151_s30 = scalar_lea.sflag [#allocation4], %s509_s21  ;;  %s324_s2 = scalar_lea.vmem %s525_s26, 128 }
  0x3a   : > { %p325_p6 = scmp.ne.s32.totalorder %s525_s26, %s324_s2  ;;  %p578_p11 = scmp.ne.s32.totalorder %s573_s18, 0 }
  0x3b   : > { %s393_s10 = smov [#allocation5]  }
  0x3c   : > { %p326_p12 = pnand %p325_p6, %p578_p11  ;;  %s328_s3 = sshll.u32 %s393_s10, 4  ;;  %s329_s3 = int_to_ptr.vmem [resolvable:$false] %s328_s3 }
  0x3d   : > { %s330_s4 = scalar_lea.vmem %s329_s3, 256  ;;  %p331_p7 = scmp.lt.s32.totalorder %s525_s26, %s329_s3 }
  0x3e   : > { %p327_p13 = pneg %p326_p12  ;;  %p332_p10 = scmp.lt.s32.totalorder %s330_s4, %s324_s2 }
  0x40   : > { %p333_p2 = por %p332_p10, %p331_p7 }
  0x42   : > { %p334_p4 = pnand %p333_p2, %p327_p13 }
  0xc6   : > { %v136_v2 = vpop.xlane.xlu0 %135 }
  0xc7   : > { %v138_v3 = vmul.f32 0.0625, %v136_v2 }
  0xc9   : > { %v139_v4 = vsub.f32 %v132_v0, %v138_v3 }
  0xcb   : > { %v140_v5 = vmul.f32 %v139_v4, %v139_v4 }
  0xcd   : > { %v141_v6 = vsel %vm133_vm0, %v140_v5, 0.0 }
  0xce   : > { %142 = vadd.xlane.f32.xlu0 %v141_v6 }
 0x15b   : > { %v143_v7 = vpop.xlane.xlu0 %142 }
 0x15c   : > { %v145_v8 = vmul.f32 0.06666667, %v143_v7 }
 0x15e   : > { %v146_v9 = vadd.f32 1e-05, %v145_v8 }
 0x160   : > { %292 = vrsqrt.f32 %v146_v9 }
 0x16a   : > { %v293_v10 = vpop.eup %292 }
 0x16b   : > { %v148_v11 = vmul.f32 %v293_v10, %v139_v4 }
 0x16d   : > { %149 = vst.msk [vmem:[%s131_s25] sm:$0xff] %vm133_vm0, %v148_v11 }
 0x16e   : > { %337 = shalt.err (!%p334_p4)
}
 0x16f   : > { %s338_s5 = scalar_lea.hbm %s523_s29, 128  ;;  %s342_s14 = scalar_lea.hbm %s569_s1, 256 }
 0x170   : > { %p339_p5 = scmp.ne.s32.totalorder %s523_s29, %s338_s5  ;;  %p343_p0 = scmp.lt.u32.totalorder %s523_s29, %s569_s1 }
 0x171   : > { %p344_p1 = scmp.lt.u32.totalorder %s342_s14, %s338_s5  ;;  %p346_p6 = scmp.lt.u32.totalorder %s338_s5, %s523_s29 }
 0x172   : > { %p340_p8 = pnand %p339_p5, %p578_p11 }
 0x173   : > { %p345_p3 = por %p344_p1, %p343_p0 }
 0x174   : > { %p341_p9 = pneg %p340_p8 }
 0x175   : > { %p347_p12 = por %p346_p6, %p345_p3 }
 0x177   : > { %p348_p13 = pnand %p347_p12, %p341_p9 }
 0x179   : > { %351 = shalt.err (!%p348_p13)
}
 0x17a   : > { %248 = dma.vmem_to_hbm [thread:$0]  (%p578_p11), %s525_s26, 128, %s523_s29, %s151_s30  }
 0x17b PF: > { %s176_s21 = sand.u32 1, %s378_s6   ;;  %p579_p7 = scmp.ne.s32.totalorder %s574_s19, 0 }
 0x17c   : > { %p580_p10 = scmp.ge.s32.totalorder %s390_s9, 2  ;;  %s177_s22 = scalar_lea.sflag [#allocation4], %s176_s21 }
 0x17e   : > { %p255_p2 = pnand %p580_p10, %p579_p7 }
 0x180   : > { %373 = dma.done.wait (!%p255_p2), %s177_s22, 128  }
 0x181   : > { %375 = vsyncadd (!%p255_p2), %s177_s22, 4294967168  ;;  %p14_p4 = scmp.ge.s32.totalorder %s429_s12, 4   ;;  %s581_s6 = smov %s382_s7 }
 0x182   : > { %s582_s7 = smov %s386_s8  ;;  %s583_s8 = smov %s441_s15 }
 0x183   : > { %s584_s9 = smov %s429_s12  ;;  %16 = sbr.rel (!%p14_p4) target bundleno = 5 (0x5), region = 69 }
 0x18a   :  { %182 = vsyncpa [#allocation3], 1 }
 0x18b   :  { %184 = vsyncpa [#allocation3 + $0x1], 1 }
 0x18c   :  { %185 = vsyncpa [#allocation4], 1 }
 0x18d   :  { %187 = vsyncpa [#allocation4 + $0x1], 1 }

</bundles_post_ra>
